<compile_context>
chip_gen: v7x
topology: tpu7x:2x2x1
jax: 0.10.0
libtpu: 0.0.40
codegen_flags: <defaults>
</compile_context>

<pallas_src>
import math

import jax
import jax.numpy as jnp
from jax import lax
from jax.experimental import pallas as pl
from jax.experimental.pallas import tpu as pltpu


def _round_up(x: int, m: int) -> int:
    return (x + m - 1) // m * m


def _default_tm_max() -> int:
    """v5e/v6e: tm up to 2048 (128 MiB VMEM).  v7x & unknown: 1024 (64 MiB,
    and >=2 token blocks keeps the 'parallel' axis feeding both TensorCores)."""
    try:
        kind = jax.devices()[0].device_kind.lower()
    except Exception:  # pragma: no cover - device query best-effort only
        return 1024
    if "v5" in kind or "v6" in kind:
        return 2048
    return 1024


# ----------------------------------------------------------------------------
# Kernel: dense(H->H) -> gelu -> LayerNorm -> decoder(H->V) + bias
# ----------------------------------------------------------------------------
def _make_mlm_kernel(eps: float):
    # Python floats become jaxpr literals (not captured traced constants).
    inv_sqrt2 = 1.0 / math.sqrt(2.0)

    def kernel(x_ref, w1_ref, b1_ref, g_ref, beta_ref, w2_ref, dbias_ref,
               out_ref, h_scratch):
        # Transform once per token block (vocab block 0), cache in VMEM scratch.
        @pl.when(pl.program_id(1) == 0)
        def _():
            # x and w1 are already bf16 (cast hoisted to the wrapper / prepare).
            h = jnp.dot(x_ref[...], w1_ref[...],
                        preferred_element_type=jnp.float32)
            h = h + b1_ref[...]
            # exact gelu: x * 0.5 * (1 + erf(x / sqrt(2)))
            h = h * 0.5 * (1.0 + lax.erf(h * inv_sqrt2))
            # LayerNorm over hidden, one-pass variance (f32 math).
            mu = jnp.mean(h, axis=-1, keepdims=True)
            ex2 = jnp.mean(h * h, axis=-1, keepdims=True)
            var = jnp.maximum(ex2 - mu * mu, 0.0)
            h = (h - mu) * lax.rsqrt(var + eps)
            h = h * g_ref[...] + beta_ref[...]
            h_scratch[...] = h.astype(jnp.bfloat16)

        # Decoder tile: [tm, H]bf16 @ [H, tv]bf16 -> f32 accumulate, + bias.
        scores = jnp.dot(h_scratch[...], w2_ref[...],
                         preferred_element_type=jnp.float32)
        out_ref[...] = (scores + dbias_ref[...]).astype(out_ref.dtype)

    return kernel


# ----------------------------------------------------------------------------
# One-time parameter preparation (HOISTED out of the per-step path)
# ----------------------------------------------------------------------------
def prepare_heads_params(params, *, tv_max=1024):
    """Cast matmul weights to bf16, pad the decoder weight/bias to a multiple
    of the vocab tile, and reshape the 1-D vectors.  Call ONCE at model-build
    time so no convert/pad of the ~47 MB decoder weight happens per step."""
    H, V = params["decoder_w"].shape
    tv = min(tv_max, _round_up(V, 128))
    v_pad = _round_up(V, tv)

    w2 = params["decoder_w"].astype(jnp.bfloat16)
    db = params["decoder_bias"].astype(jnp.float32)
    if v_pad != V:
        # Zero weight columns + zero bias pad -> padded logits are exactly 0.
        w2 = jnp.pad(w2, ((0, 0), (0, v_pad - V)))
        db = jnp.pad(db, (0, v_pad - V))

    return {
        "transform_dense_w": params["transform_dense_w"].astype(jnp.bfloat16),
        "transform_dense_b": params["transform_dense_b"].astype(jnp.float32).reshape(1, H),
        "ln_gamma": params["ln_gamma"].astype(jnp.float32).reshape(1, H),
        "ln_beta": params["ln_beta"].astype(jnp.float32).reshape(1, H),
        "decoder_w": w2,                       # [H, v_pad] bf16
        "decoder_bias": db.reshape(1, v_pad),  # [1, v_pad] f32
        "seq_rel_w": params["seq_rel_w"],
        "seq_rel_b": params["seq_rel_b"],
        "vocab_size": V,
        "tv": tv,
    }


# ----------------------------------------------------------------------------
# MLM prediction head (Pallas)
# ----------------------------------------------------------------------------
def mlm_prediction_head(x_tokens, prep, *, eps=1e-12, tm_max=None,
                        out_dtype=jnp.float32, unpad_vocab=True):
    """x_tokens: [N, H] -> prediction scores [N, V] (out_dtype)."""
    N, H = x_tokens.shape
    V = prep["vocab_size"]
    tv = prep["tv"]
    v_pad = prep["decoder_w"].shape[1]

    if tm_max is None:
        tm_max = _default_tm_max()
    tm = min(tm_max, _round_up(N, 8))
    n_pad = _round_up(N, tm)

    # bf16 tokens: half the DMA / x double-buffer, no in-kernel cast.
    x_bf = x_tokens.astype(jnp.bfloat16)
    if n_pad != N:
        x_bf = jnp.pad(x_bf, ((0, n_pad - N), (0, 0)))

    grid = (n_pad // tm, v_pad // tv)

    # VMEM budget: double-buffered x/w1/w2/bias/out + transform scratch.
    # NOTE: constant-index inputs (w1/b1/gamma/beta) could be single-buffered
    # with pipeline_mode=pl.Buffered(1); skipped since the estimate below is
    # well under every generation's physical VMEM at these tile sizes.
    out_itemsize = jnp.dtype(out_dtype).itemsize
    est = (2 * tm * H * 2          # x (bf16, double-buffered)
           + 2 * H * H * 2         # dense W (bf16)
           + 6 * H * 4             # b1 / gamma / beta (f32)
           + 2 * H * tv * 2        # decoder W tile (bf16)
           + 2 * tv * 4            # decoder bias tile
           + 2 * tm * tv * out_itemsize   # output tile
           + tm * H * 2)           # bf16 transform scratch
    vmem_limit = min(max(int(1.5 * est), 48 * 1024 * 1024), 100 * 1024 * 1024)

    out = pl.pallas_call(
        _make_mlm_kernel(float(eps)),
        out_shape=jax.ShapeDtypeStruct((n_pad, v_pad), out_dtype),
        grid_spec=pltpu.PrefetchScalarGridSpec(
            num_scalar_prefetch=0,
            grid=grid,
            in_specs=[
                pl.BlockSpec((tm, H), lambda i, j: (i, 0)),     # tokens (bf16)
                pl.BlockSpec((H, H), lambda i, j: (0, 0)),      # dense W (bf16)
                pl.BlockSpec((1, H), lambda i, j: (0, 0)),      # dense b
                pl.BlockSpec((1, H), lambda i, j: (0, 0)),      # LN gamma
                pl.BlockSpec((1, H), lambda i, j: (0, 0)),      # LN beta
                pl.BlockSpec((H, tv), lambda i, j: (0, j)),     # decoder W (bf16)
                pl.BlockSpec((1, tv), lambda i, j: (0, j)),     # decoder bias
            ],
            out_specs=pl.BlockSpec((tm, tv), lambda i, j: (i, j)),
            scratch_shapes=[pltpu.VMEM((tm, H), jnp.bfloat16)],
        ),
        compiler_params=pltpu.CompilerParams(
            # token axis parallel (v7x megacore), vocab axis carries the scratch
            dimension_semantics=("parallel", "arbitrary"),
            vmem_limit_bytes=vmem_limit,
        ),
    )(x_bf, prep["transform_dense_w"], prep["transform_dense_b"],
      prep["ln_gamma"], prep["ln_beta"], prep["decoder_w"], prep["decoder_bias"])

    if unpad_vocab:
        # Exact module semantics.  For full-size BERT vocab prefer
        # unpad_vocab=False and mask padded (zero) columns in the loss: this
        # slice materializes a full N x V copy.
        out = out[:N, :V]
    elif n_pad != N:
        out = out[:N]
    return out


# ----------------------------------------------------------------------------
# Module wrapper (BertPreTrainingHeads.forward)
# ----------------------------------------------------------------------------
def bert_pretraining_heads(sequence_output, pooled_output, params,
                           *, eps=1e-12, tm_max=None, tv_max=1024,
                           out_dtype=jnp.float32):
    # Accept either raw params or already-prepared params (preferred: prepare
    # once outside the training step).
    prep = params if "vocab_size" in params else prepare_heads_params(
        params, tv_max=tv_max)

    B, S, H = sequence_output.shape
    x_tok = sequence_output.reshape(B * S, H)
    scores_flat = mlm_prediction_head(x_tok, prep, eps=eps, tm_max=tm_max,
                                      out_dtype=out_dtype)
    V = prep["vocab_size"]
    prediction_scores = scores_flat.reshape(B, S, V)

    # NSP head: [B, 2] output is too small for a useful Pallas kernel; plain JAX.
    seq_relationship_score = (pooled_output @ prep["seq_rel_w"]
                              + prep["seq_rel_b"])
    return prediction_scores, seq_relationship_score


# Pure-JAX f32 reference for verification.
def _reference(sequence_output, pooled_output, params, eps=1e-12):
    h = sequence_output @ params["transform_dense_w"] + params["transform_dense_b"]
    h = h * 0.5 * (1.0 + lax.erf(h / jnp.sqrt(2.0)))
    mu = jnp.mean(h, axis=-1, keepdims=True)
    var = jnp.mean((h - mu) ** 2, axis=-1, keepdims=True)
    h = (h - mu) / jnp.sqrt(var + eps)
    h = h * params["ln_gamma"] + params["ln_beta"]
    pred = h @ params["decoder_w"] + params["decoder_bias"]
    nsp = pooled_output @ params["seq_rel_w"] + params["seq_rel_b"]
    return pred, nsp


if __name__ == "__main__":
    # Small shapes consistent with the module: B=2, S=8, H=32, V=300.
    # V=300 (not a multiple of 128) exercises the vocab-padding path; small
    # tile overrides exercise the multi-block grid + scratch-reuse logic.
    B, S, H, V = 2, 8, 32, 300
    key = jax.random.PRNGKey(0)
    ks = jax.random.split(key, 10)

    sequence_output = jax.random.normal(ks[0], (B, S, H), dtype=jnp.float32)
    pooled_output = jax.random.normal(ks[1], (B, H), dtype=jnp.float32)

    scale = 0.02
    params = {
        # BertPredictionHeadTransform.dense  (stored as [in, out])
        "transform_dense_w": scale * jax.random.normal(ks[2], (H, H), jnp.float32),
        "transform_dense_b": scale * jax.random.normal(ks[3], (H,), jnp.float32),
        # LayerNorm
        "ln_gamma": 1.0 + 0.1 * jax.random.normal(ks[7], (H,), jnp.float32),
        "ln_beta": 0.1 * jax.random.normal(ks[8], (H,), jnp.float32),
        # BertLMPredictionHead.decoder (no bias) + separate bias parameter
        "decoder_w": scale * jax.random.normal(ks[4], (H, V), jnp.float32),
        "decoder_bias": scale * jax.random.normal(ks[9], (V,), jnp.float32),
        # seq_relationship Linear(H, 2)
        "seq_rel_w": scale * jax.random.normal(ks[5], (H, 2), jnp.float32),
        "seq_rel_b": scale * jax.random.normal(ks[6], (2,), jnp.float32),
    }

    # One-time weight prep (bf16 cast + vocab pad) — hoisted out of the step.
    prep = prepare_heads_params(params, tv_max=128)
    prep = jax.block_until_ready(prep)

    pred, nsp = bert_pretraining_heads(sequence_output, pooled_output, prep,
                                       tm_max=8)
    jax.block_until_ready((pred, nsp))

    pred_ref, nsp_ref = _reference(sequence_output, pooled_output, params)
    assert pred.shape == (B, S, V) and nsp.shape == (B, 2)
    # bf16 matmul operands (f32 accumulate) -> relaxed tolerance vs f32 ref.
    assert jnp.allclose(pred, pred_ref, atol=2e-2, rtol=2e-2), (
        float(jnp.max(jnp.abs(pred - pred_ref))))
    assert jnp.allclose(nsp, nsp_ref, atol=1e-5, rtol=1e-5)

    print("KERNEL_OK")
</pallas_src>

<mosaic_0001>
module attributes {stable_mosaic.version = 11 : i64} {
  func.func @kernel(%arg0: i32, %arg1: i32, %arg2: memref<8x32xbf16, #tpu.memory_space<vmem>>, %arg3: memref<32x32xbf16, #tpu.memory_space<vmem>>, %arg4: memref<1x32xf32, #tpu.memory_space<vmem>>, %arg5: memref<1x32xf32, #tpu.memory_space<vmem>>, %arg6: memref<1x32xf32, #tpu.memory_space<vmem>>, %arg7: memref<32x128xbf16, #tpu.memory_space<vmem>>, %arg8: memref<1x128xf32, #tpu.memory_space<vmem>>, %arg9: memref<8x128xf32, #tpu.memory_space<vmem>>, %arg10: memref<8x32xbf16, #tpu.memory_space<vmem>>) attributes {dimension_semantics = [#tpu.dimension_semantics<parallel>, #tpu.dimension_semantics<arbitrary>], iteration_bounds = array<i64: 2, 3>, scalar_prefetch = 0 : i64, scratch_operands = 1 : i64, tpu.core_type = #tpu.core_type<tc>, window_params = [{transform_indices = @transform_0, window_bounds = array<i64: 8, 32>}, {pipeline_mode = #tpu.pipeline_mode<synchronous>, transform_indices = @transform_1, window_bounds = array<i64: 32, 32>}, {pipeline_mode = #tpu.pipeline_mode<synchronous>, transform_indices = @transform_2, window_bounds = array<i64: 1, 32>}, {pipeline_mode = #tpu.pipeline_mode<synchronous>, transform_indices = @transform_3, window_bounds = array<i64: 1, 32>}, {pipeline_mode = #tpu.pipeline_mode<synchronous>, transform_indices = @transform_4, window_bounds = array<i64: 1, 32>}, {transform_indices = @transform_5, window_bounds = array<i64: 32, 128>}, {transform_indices = @transform_6, window_bounds = array<i64: 1, 128>}, {transform_indices = @transform_7, window_bounds = array<i64: 8, 128>}]} {
    %c0_i32 = arith.constant 0 : i32
    %0 = arith.cmpi eq, %arg1, %c0_i32 : i32
    %1 = arith.extui %0 : i1 to i32
    %c0_i32_0 = arith.constant 0 : i32
    %2 = arith.cmpi ne, %1, %c0_i32_0 : i32
    scf.if %2 {
      %c0_8 = arith.constant 0 : index
      %c0_9 = arith.constant 0 : index
      %10 = vector.load %arg2[%c0_8, %c0_9] : memref<8x32xbf16, #tpu.memory_space<vmem>>, vector<8x32xbf16>
      %c0_10 = arith.constant 0 : index
      %c0_11 = arith.constant 0 : index
      %11 = vector.load %arg3[%c0_10, %c0_11] : memref<32x32xbf16, #tpu.memory_space<vmem>>, vector<32x32xbf16>
      %cst_12 = arith.constant dense<0.000000e+00> : vector<8x32xf32>
      %12 = tpu.matmul %10, %11, %cst_12 {dimension_numbers = #tpu.dot_dimension_numbers<[1], [0], [0], [1], [0, 0, 1, 1], [], []>} : vector<8x32xbf16>, vector<32x32xbf16>, vector<8x32xf32> -> vector<8x32xf32>
      %c0_13 = arith.constant 0 : index
      %c0_14 = arith.constant 0 : index
      %13 = vector.load %arg4[%c0_13, %c0_14] : memref<1x32xf32, #tpu.memory_space<vmem>>, vector<1x32xf32>
      %14 = vector.broadcast %13 : vector<1x32xf32> to vector<8x32xf32>
      %15 = arith.addf %12, %14 : vector<8x32xf32>
      %cst_15 = arith.constant 5.000000e-01 : f32
      %16 = vector.broadcast %cst_15 : f32 to vector<8x32xf32>
      %17 = arith.mulf %15, %16 : vector<8x32xf32>
      %cst_16 = arith.constant 0.707106769 : f32
      %18 = vector.broadcast %cst_16 : f32 to vector<8x32xf32>
      %19 = arith.mulf %15, %18 : vector<8x32xf32>
      %20 = math.erf %19 : vector<8x32xf32>
      %cst_17 = arith.constant 1.000000e+00 : f32
      %21 = vector.broadcast %cst_17 : f32 to vector<8x32xf32>
      %22 = arith.addf %21, %20 : vector<8x32xf32>
      %23 = arith.mulf %17, %22 : vector<8x32xf32>
      %cst_18 = arith.constant dense<0.000000e+00> : vector<8xf32>
      %24 = vector.multi_reduction <add>, %23, %cst_18 [1] : vector<8x32xf32> to vector<8xf32>
      %25 = vector.shape_cast %24 : vector<8xf32> to vector<8x1xf32>
      %cst_19 = arith.constant 3.200000e+01 : f32
      %26 = vector.broadcast %cst_19 : f32 to vector<8x1xf32>
      %27 = arith.divf %25, %26 : vector<8x1xf32>
      %28 = arith.mulf %23, %23 : vector<8x32xf32>
      %cst_20 = arith.constant dense<0.000000e+00> : vector<8xf32>
      %29 = vector.multi_reduction <add>, %28, %cst_20 [1] : vector<8x32xf32> to vector<8xf32>
      %30 = vector.shape_cast %29 : vector<8xf32> to vector<8x1xf32>
      %cst_21 = arith.constant 3.200000e+01 : f32
      %31 = vector.broadcast %cst_21 : f32 to vector<8x1xf32>
      %32 = arith.divf %30, %31 : vector<8x1xf32>
      %33 = arith.mulf %27, %27 : vector<8x1xf32>
      %34 = arith.subf %32, %33 : vector<8x1xf32>
      %cst_22 = arith.constant 0.000000e+00 : f32
      %35 = vector.broadcast %cst_22 : f32 to vector<8x1xf32>
      %36 = arith.maximumf %34, %35 : vector<8x1xf32>
      %37 = vector.broadcast %27 : vector<8x1xf32> to vector<8x32xf32>
      %38 = arith.subf %23, %37 : vector<8x32xf32>
      %cst_23 = arith.constant 9.99999996E-13 : f32
      %39 = vector.broadcast %cst_23 : f32 to vector<8x1xf32>
      %40 = arith.addf %36, %39 : vector<8x1xf32>
      %41 = math.rsqrt %40 : vector<8x1xf32>
      %42 = vector.broadcast %41 : vector<8x1xf32> to vector<8x32xf32>
      %43 = arith.mulf %38, %42 : vector<8x32xf32>
      %c0_24 = arith.constant 0 : index
      %c0_25 = arith.constant 0 : index
      %44 = vector.load %arg5[%c0_24, %c0_25] : memref<1x32xf32, #tpu.memory_space<vmem>>, vector<1x32xf32>
      %45 = vector.broadcast %44 : vector<1x32xf32> to vector<8x32xf32>
      %46 = arith.mulf %43, %45 : vector<8x32xf32>
      %c0_26 = arith.constant 0 : index
      %c0_27 = arith.constant 0 : index
      %47 = vector.load %arg6[%c0_26, %c0_27] : memref<1x32xf32, #tpu.memory_space<vmem>>, vector<1x32xf32>
      %48 = vector.broadcast %47 : vector<1x32xf32> to vector<8x32xf32>
      %49 = arith.addf %46, %48 : vector<8x32xf32>
      %50 = arith.truncf %49 : vector<8x32xf32> to vector<8x32xbf16>
      %c0_28 = arith.constant 0 : index
      %c0_29 = arith.constant 0 : index
      %51 = vector.load %arg10[%c0_28, %c0_29] : memref<8x32xbf16, #tpu.memory_space<vmem>>, vector<8x32xbf16>
      tpu.vector_store %arg10[%c0_28, %c0_29], %50 {strides = array<i32>} : memref<8x32xbf16, #tpu.memory_space<vmem>>, vector<8x32xbf16>,
    } else {
    }
    %c0 = arith.constant 0 : index
    %c0_1 = arith.constant 0 : index
    %3 = vector.load %arg10[%c0, %c0_1] : memref<8x32xbf16, #tpu.memory_space<vmem>>, vector<8x32xbf16>
    %c0_2 = arith.constant 0 : index
    %c0_3 = arith.constant 0 : index
    %4 = vector.load %arg7[%c0_2, %c0_3] : memref<32x128xbf16, #tpu.memory_space<vmem>>, vector<32x128xbf16>
    %cst = arith.constant dense<0.000000e+00> : vector<8x128xf32>
    %5 = tpu.matmul %3, %4, %cst {dimension_numbers = #tpu.dot_dimension_numbers<[1], [0], [0], [1], [0, 0, 1, 1], [], []>} : vector<8x32xbf16>, vector<32x128xbf16>, vector<8x128xf32> -> vector<8x128xf32>
    %c0_4 = arith.constant 0 : index
    %c0_5 = arith.constant 0 : index
    %6 = vector.load %arg8[%c0_4, %c0_5] : memref<1x128xf32, #tpu.memory_space<vmem>>, vector<1x128xf32>
    %7 = vector.broadcast %6 : vector<1x128xf32> to vector<8x128xf32>
    %8 = arith.addf %5, %7 : vector<8x128xf32>
    %c0_6 = arith.constant 0 : index
    %c0_7 = arith.constant 0 : index
    %9 = vector.load %arg9[%c0_6, %c0_7] : memref<8x128xf32, #tpu.memory_space<vmem>>, vector<8x128xf32>
    tpu.vector_store %arg9[%c0_6, %c0_7], %8 {strides = array<i32>} : memref<8x128xf32, #tpu.memory_space<vmem>>, vector<8x128xf32>,
    return
  }
  func.func @transform_0(%arg0: i32, %arg1: i32) -> (i32, i32) {
    %c0_i32 = arith.constant 0 : i32
    %c0_i32_0 = arith.constant 0 : i32
    return %arg0, %c0_i32 : i32, i32
  }
  func.func @transform_1(%arg0: i32, %arg1: i32) -> (i32, i32) {
    %c0_i32 = arith.constant 0 : i32
    %c0_i32_0 = arith.constant 0 : i32
    %c0_i32_1 = arith.constant 0 : i32
    return %c0_i32, %c0_i32_0 : i32, i32
  }
  func.func @transform_2(%arg0: i32, %arg1: i32) -> (i32, i32) {
    %c0_i32 = arith.constant 0 : i32
    %c0_i32_0 = arith.constant 0 : i32
    %c0_i32_1 = arith.constant 0 : i32
    return %c0_i32, %c0_i32_0 : i32, i32
  }
  func.func @transform_3(%arg0: i32, %arg1: i32) -> (i32, i32) {
    %c0_i32 = arith.constant 0 : i32
    %c0_i32_0 = arith.constant 0 : i32
    %c0_i32_1 = arith.constant 0 : i32
    return %c0_i32, %c0_i32_0 : i32, i32
  }
  func.func @transform_4(%arg0: i32, %arg1: i32) -> (i32, i32) {
    %c0_i32 = arith.constant 0 : i32
    %c0_i32_0 = arith.constant 0 : i32
    %c0_i32_1 = arith.constant 0 : i32
    return %c0_i32, %c0_i32_0 : i32, i32
  }
  func.func @transform_5(%arg0: i32, %arg1: i32) -> (i32, i32) {
    %c0_i32 = arith.constant 0 : i32
    %c0_i32_0 = arith.constant 0 : i32
    return %c0_i32, %arg1 : i32, i32
  }
  func.func @transform_6(%arg0: i32, %arg1: i32) -> (i32, i32) {
    %c0_i32 = arith.constant 0 : i32
    %c0_i32_0 = arith.constant 0 : i32
    return %c0_i32, %arg1 : i32, i32
  }
  func.func @transform_7(%arg0: i32, %arg1: i32) -> (i32, i32) {
    %c0_i32 = arith.constant 0 : i32
    return %arg0, %arg1 : i32, i32
  }
}

</mosaic_0001>

<bundles_post_ra>
// kernel: tpu_custom_call.1
= control target key start
LH: loop header
LB: loop body
LE: loop exit
PB: predicated region body
PF: predicated region fallthrough
CT: control target
= control target key end

     0   :  { %s1623_s0 = inlined_call_operand.hbm [shape: bf16[16,32], index: 0, kind: input, shape index: {}]   ;;  %s1624_s1 = inlined_call_operand.hbm [shape: bf16[32,32], index: 1, kind: input, shape index: {}]   ;;  %s1625_s2 = inlined_call_operand.vmem [shape: f32[1,32], index: 2, kind: input, shape index: {}]   ;;  %s1626_s3 = inlined_call_operand.vmem [shape: f32[1,32], index: 3, kind: input, shape index: {}]   ;;  %s1627_s4 = inlined_call_operand.vmem [shape: f32[1,32], index: 4, kind: input, shape index: {}]   ;;  %s1628_s5 = inlined_call_operand.hbm [shape: bf16[32,384], index: 5, kind: input, shape index: {}]   ;;  %s1629_s6 = inlined_call_operand.vmem [shape: f32[1,384], index: 6, kind: input, shape index: {}]   ;;  %s1630_s7 = inlined_call_operand.hbm [shape: f32[16,384], index: 7, kind: output, shape index: {}]  }
   0x1   :  { %1646 = sst [smem:[#allocation26_spill]] %s1623_s0 }
   0x2   :  { %1647 = sst [smem:[#allocation27_spill]] %s1625_s2 }
   0x3   :  { %1648 = sst [smem:[#allocation28_spill]] %s1626_s3 }
   0x4   :  { %1649 = sst [smem:[#allocation29_spill]] %s1627_s4 }
   0x5   :  { %1650 = sst [smem:[#allocation30_spill]] %s1629_s6 }
   0x6   :  { %1651 = sst [smem:[#allocation31_spill]] %s1630_s7 }
   0x7   :  { %12 = vsyncpa [#allocation4], 0 }
   0x8   :  { %14 = vsyncpa [#allocation4 + $0x1], 0 }
   0x9   :  { %15 = vsyncpa [#allocation7], 0 }
   0xa   :  { %16 = vsyncpa [#allocation5], 0 }
   0xb   :  { %18 = vsyncpa [#allocation5 + $0x1], 0  ;;  %s1198_s24 = smov 0   ;;  %s1200_s25 = smov 0  }
   0xc   :  { %s1202_s26 = smov 0   ;;  %s1204_s27 = smov 0  }
   0xd   :  { %s1206_s28 = smov 0   ;;  %s1208_s29 = smov 0  }
   0xe   :  { %s1210_s30 = smov 0   ;;  %s1212_s8 = smov 0  }
   0xf   :  { %s1214_s9 = smov 0   ;;  %s1216_s10 = smov 0  }
  0x10   :  { %s1218_s11 = smov 0   ;;  %s1220_s12 = smov 0  }
  0x11   :  { %s1222_s13 = smov 0   ;;  %s1224_s14 = smov 0  }
  0x12 LB: > { %1652 = sst [smem:[#allocation14_spill]] %s1101_s26  ;;  %s33_s15 = sadd.s32 1, %s1137_s12  ;;  %s1145_s14 = sphi %s1224_s14, %s24_s14   ;;  %s1141_s13 = sphi %s1222_s13, %s1705_s13   ;;  %s1137_s12 = sphi %s1220_s12, %s1704_s12   ;;  %s1133_s11 = sphi %s1218_s11, %s1713_s11   ;;  %s1129_s10 = sphi %s1216_s10, %s1712_s10   ;;  %s1125_s9 = sphi %s1214_s9, %s1701_s9   ;;  %s1121_s8 = sphi %s1212_s8, %s1711_s8   ;;  %s1117_s30 = sphi %s1210_s30, %s1710_s30   ;;  %s1113_s29 = sphi %s1208_s29, %s1699_s29   ;;  %s1109_s28 = sphi %s1206_s28, %s1709_s28   ;;  %s1105_s27 = sphi %s1204_s27, %s1708_s27   ;;  %s1101_s26 = sphi %s1202_s26, %s1697_s26   ;;  %s1097_s25 = sphi %s1200_s25, %s1707_s25   ;;  %s1093_s24 = sphi %s1198_s24, %s1706_s24  }
  0x13   : > { %1653 = sst [smem:[#allocation15_spill]] %s1113_s29  ;;  %s36_s16 = sadd.s32 1, %s1141_s13 }
  0x14   : > { %1654 = sst [smem:[#allocation16_spill]] %s1125_s9  ;;  %p34_p0 = scmp.ge.s32.totalorder %s33_s15, 3 }
  0x15   : > { %1655 = sst [smem:[#allocation17_spill]] %s1129_s10  ;;  %s43_s17 = sadd.s32 1, %s1125_s9 }
  0x16   : > { %1656 = sst [smem:[#allocation18_spill]] %s1133_s11  ;;  %p50_p1 = scmp.ne.s32.totalorder %s1125_s9, %s1121_s8 }
  0x17   : > { %1657 = sst [smem:[#allocation19_spill]] %s1137_s12  ;;  %p51_p2 = scmp.eq.s32.totalorder %s1145_s14, 0 }
  0x18   : > { %1658 = sst [smem:[#allocation20_spill]] %s1141_s13  ;;  %s1715_s15 = smov (%p34_p0, %s33_s15), 0 }
  0x19   : > { %1659 = sst [smem:[#allocation21_spill]] %s1715_s15  ;;  %s1717_s16 = smov (!%p34_p0, %s36_s16), %s1141_s13 }
  0x1a   : > { %p1279_p3 = por %p51_p2, %p50_p1  ;;  %p38_p5 = scmp.ge.s32.totalorder %s1717_s16, 2 }
  0x1b   : > { %s150_s19 = ssub.s32 %s1137_s12, %s1715_s15  ;;  %s153_s20 = sadd.s32 1, %s1113_s29 }
  0x1c   : > { %p151_p6 = scmp.eq.s32.totalorder %s150_s19, 0  ;;  %s1719_s16 = smov (%p38_p5, %s1717_s16), 0 }
  0x1d   : > { %1661 = sst [smem:[#allocation22_spill]] %s1719_s16  ;;  %s40_s22 = ssub.s32 %s1141_s13, %s1719_s16 }
  0x1e   : > { %s1291_s21 = scalar_select %p151_p6, %s1113_s29, %s153_s20  }
  0x1f   : > { %p160_p7 = scmp.ne.s32.totalorder %s1113_s29, %s1109_s28  ;;  %p41_p8 = scmp.eq.s32.totalorder %s40_s22, 0 }
  0x20   : > { %1662 = sst [smem:[#allocation23_spill]] %s1291_s21  ;;  %s204_s15 = sor.u32 %s150_s19, %s40_s22 }
  0x21   : > { %p1301_p10 = por %p160_p7, %p51_p2  ;;  %p205_p11 = scmp.eq.s32.totalorder %s204_s15, 0 }
  0x22   : > { %s1306_s7 = scalar_select %p41_p8, %s1125_s9, %s43_s17  }
  0x23   : > { %s207_s11 = sadd.s32 1, %s1101_s26  ;;  %p772_p12 = scmp.lt.s32.totalorder %s1145_s14, 6 }
  0x24   : > { %1664 = sst [smem:[#allocation24_spill]] %s1306_s7  ;;  %s266_s20 = sand.u32 1, %s1145_s14  }
  0x25   : > { %s1311_s4 = scalar_select %p205_p11, %s1101_s26, %s207_s11  }
  0x26   : > { %s268_s16 = sand.u32 1, %s1125_s9   ;;  %s700_s3 = sshll.u32 %s1141_s13, 6 }
  0x27   : > { %1665 = sst [smem:[#allocation25_spill]] %s1311_s4  ;;  %s699_s21 = sshll.u32 %s268_s16, 2 }
  0x28   : > { %s1666_s0 = sld [smem:[#allocation26_spill]]  ;;  %s270_s17 = scalar_lea.vmem [#allocation3], %s699_s21 }
  0x29   : > { %s277_s19 = sshll.u32 %s270_s17, 4  ;;  %p1325_p13 = pnand %p772_p12, %p1279_p3  ;;  %s1321_s19 = int_to_ptr.vmem [resolvable:$true] %s277_s19 }
  0x2a   : > { %p1331_p0 = pnand %p772_p12, %p1301_p10 }
  0x2b   : > { %p905_p2 = pneg %p1325_p13 }
  0x2c   : > { %s1668_s2 = scalar_select %p1331_p0, 1, 0 }
  0x2e   : > { %s1319_s10 = scalar_lea.hbm %s1666_s0, %s700_s3  ;;  %s1335_s3 = scalar_lea.sflag [#allocation4], %s266_s20 }
  0x2f   : > { %s903_s6 = scalar_lea.hbm %s1319_s10, 64  ;;  %s908_s18 = scalar_lea.hbm %s1666_s0, 128 }
  0x30   : > { %p904_p1 = scmp.ne.s32.totalorder %s1319_s10, %s903_s6  ;;  %p909_p6 = scmp.lt.u32.totalorder %s1319_s10, %s1666_s0 }
  0x31   : > { %p910_p7 = scmp.lt.u32.totalorder %s908_s18, %s903_s6  ;;  %p912_p10 = scmp.lt.u32.totalorder %s903_s6, %s1319_s10 }
  0x32   : > { %p906_p5 = pnand %p905_p2, %p904_p1 }
  0x33   : > { %p911_p8 = por %p910_p7, %p909_p6 }
  0x34   : > { %p907_p3 = pneg %p906_p5 }
  0x35   : > { %p913_p11 = por %p912_p10, %p911_p8 }
  0x37   : > { %p914_p12 = pnand %p913_p11, %p907_p3 }
  0x39   : > { %917 = shalt.err (!%p914_p12)
}
  0x3a   : > { %s918_s23 = scalar_lea.vmem %s1321_s19, 64  ;;  %s1147_s20 = smov [#allocation3]  }
  0x3b   : > { %p919_p1 = scmp.ne.s32.totalorder %s1321_s19, %s918_s23  ;;  %s923_s17 = sshll.u32 %s1147_s20, 4  ;;  %s924_s17 = int_to_ptr.vmem [resolvable:$false] %s923_s17 }
  0x3c   : > { %s925_s15 = scalar_lea.vmem %s924_s17, 128  ;;  %p926_p4 = scmp.lt.s32.totalorder %s1321_s19, %s924_s17 }
  0x3d   : > { %p921_p5 = pnand %p919_p1, %p905_p2  ;;  %p927_p6 = scmp.lt.s32.totalorder %s925_s15, %s918_s23 }
  0x3f   : > { %p922_p9 = pneg %p921_p5  ;;  %p928_p7 = por %p927_p6, %p926_p4 }
  0x41   : > { %p929_p8 = pnand %p928_p7, %p922_p9 }
  0x43   : > { %932 = shalt.err (!%p929_p8)
}
  0x44   : > { %763 = dma.hbm_to_vmem [thread:$0]  (!%p1325_p13), %s1319_s10, 64, %s1321_s19, %s1335_s3  }
  0x45   : > { %s1364_s6 = sadd.s32 4294967295, %s1145_s14   ;;  %s695_s11 = sadd.s32 4294967294, %s1145_s14  }
  0x46   : > { %p1640_p4 = scmp.eq.s32.totalorder %s1364_s6, 0  ;;  %p217_p9 = scmp.ne.s32.totalorder %s1101_s26, %s1097_s25 }
  0x47   : > { %p218_p2 = scmp.eq.s32.totalorder %s1364_s6, 5  ;;  %p1669_p3 = scmp.ne.s32.totalorder %s1121_s8, %s1117_s30 }
  0x48   : > { %p1671_p13 = scmp.ne.s32.totalorder %s1109_s28, %s1105_s27  ;;  %p223_p1 = scmp.ne.s32.totalorder %s1097_s25, %s1093_s24 }
  0x49   : > { %p1376_p10 = por %p1640_p4, %p1669_p3  ;;  %p1389_p12 = por %p218_p2, %p217_p9 }
  0x4a   : > { %p1385_p11 = por %p1671_p13, %p1640_p4  ;;  %p224_p5 = scmp.eq.s32.totalorder %s695_s11, 5 }
  0x4b   : > { %s1670_s16 = scalar_select %p1376_p10, 1, 0 }
  0x4c   : > { %s1672_s10 = scalar_select %p1385_p11, 1, 0 }
  0x4d   : > { %s1673_s19 = scalar_select %p1389_p12, 1, 0 }
  0x4e   : > { %p696_p6 = scmp.ge.s32.totalorder %s1145_s14, 1  ;;  %p231_p7 = scmp.lt.s32.totalorder %s1145_s14, 7 }
  0x4f   : > { %p1397_p8 = por %p224_p5, %p223_p1  ;;  %s1148_s27 = smov [#allocation6]  }
  0x50   : > { %p1401_p3 = pnand %p696_p6, %p231_p7  ;;  %s243_s21 = sshll.u32 %s1148_s27, 4  ;;  %s1405_s21 = int_to_ptr.vmem [resolvable:$true] %s243_s21 }
  0x51   : > { %s1674_s30 = scalar_select %p1397_p8, 1, 0 }
  0x52   : > { %s1675_s18 = scalar_select %p1401_p3, 1, 0 }
  0x53   : > { %p756_p9 = pneg %p1401_p3  ;;  %s286_s22 = sand.u32 1, %s1113_s29  }
  0x54   : > { %s702_s23 = sshll.u32 %s1137_s12, 6  ;;  %s701_s17 = sshll.u32 %s286_s22, 4 }
  0x55   : > { %p1413_p2 = pnand %p756_p9, %p1640_p4  ;;  %s1420_s0 = scalar_lea.hbm %s1628_s5, %s702_s23 }
  0x56   : > { %s288_s13 = scalar_lea.vmem [#allocation8], %s701_s17  ;;  %s933_s4 = scalar_lea.hbm %s1624_s1, 256 }
  0x57   : > { %s294_s27 = sshll.u32 %s288_s13, 4  ;;  %p934_p13 = scmp.ne.s32.totalorder %s1624_s1, %s933_s4  ;;  %s1446_s27 = int_to_ptr.vmem [resolvable:$true] %s294_s27 }
  0x58   : > { %p935_p1 = pneg %p1413_p2  ;;  %p940_p7 = scmp.lt.u32.totalorder %s933_s4, %s1624_s1 }
  0x5a   : > { %p936_p5 = pnand %p935_p1, %p934_p13 }
  0x5c   : > { %p937_p6 = pneg %p936_p5 }
  0x5e   : > { %p942_p9 = pnand %p940_p7, %p937_p6 }
  0x60   : > { %945 = shalt.err (!%p942_p9)
}
  0x61   : > { %s946_s13 = scalar_lea.vmem %s1405_s21, 256  ;;  %p954_p11 = scmp.lt.s32.totalorder %s1405_s21, %s1405_s21 }
  0x62   : > { %p947_p4 = scmp.ne.s32.totalorder %s1405_s21, %s946_s13  ;;  %p955_p10 = scmp.lt.s32.totalorder %s946_s13, %s946_s13 }
  0x64   : > { %p949_p8 = pnand %p947_p4, %p935_p1  ;;  %p956_p3 = por %p955_p10, %p954_p11 }
  0x66   : > { %p950_p12 = pneg %p949_p8 }
  0x68   : > { %p957_p0 = pnand %p956_p3, %p950_p12 }
  0x6a   : > { %960 = shalt.err (!%p957_p0)
}
  0x6b   : > { %s1149_s7 = smov 64   ;;  %s1150_s4 = smov 4  }
  0x6c   : > { %759 = dma.hbm_to_vmem [thread:$0]  (!%p1413_p2), %s1624_s1, 256, %s1405_s21, [#allocation7], %s1149_s7, %s1149_s7, %s1150_s4  }
  0x6d   : > { %s961_s9 = scalar_lea.hbm %s1420_s0, 256  ;;  %p1677_p4 = scmp.ne.s32.totalorder %s1668_s2, 0 }
  0x6e   : > { %p962_p0 = scmp.ne.s32.totalorder %s1420_s0, %s961_s9  ;;  %s966_s20 = scalar_lea.hbm %s1628_s5, 768 }
  0x6f   : > { %p963_p10 = pneg %p1677_p4  ;;  %p967_p8 = scmp.lt.u32.totalorder %s1420_s0, %s1628_s5 }
  0x70   : > { %p968_p3 = scmp.lt.u32.totalorder %s966_s20, %s961_s9  ;;  %p970_p13 = scmp.lt.u32.totalorder %s961_s9, %s1420_s0 }
  0x71   : > { %p964_p11 = pnand %p963_p10, %p962_p0 }
  0x72   : > { %p969_p2 = por %p968_p3, %p967_p8 }
  0x73   : > { %p965_p12 = pneg %p964_p11 }
  0x74   : > { %p971_p1 = por %p970_p13, %p969_p2 }
  0x76   : > { %p972_p5 = pnand %p971_p1, %p965_p12 }
  0x78   : > { %975 = shalt.err (!%p972_p5)
}
  0x79   : > { %s976_s21 = scalar_lea.vmem %s1446_s27, 256  ;;  %s1151_s11 = smov [#allocation8]  }
  0x7a   : > { %p977_p6 = scmp.ne.s32.totalorder %s1446_s27, %s976_s21  ;;  %s981_s22 = sshll.u32 %s1151_s11, 4  ;;  %s982_s22 = int_to_ptr.vmem [resolvable:$false] %s981_s22 }
  0x7b   : > { %s983_s13 = scalar_lea.vmem %s982_s22, 512  ;;  %p984_p0 = scmp.lt.s32.totalorder %s1446_s27, %s982_s22 }
  0x7c   : > { %p979_p7 = pnand %p977_p6, %p963_p10  ;;  %p985_p11 = scmp.lt.s32.totalorder %s983_s13, %s976_s21 }
  0x7e   : > { %p980_p9 = pneg %p979_p7  ;;  %p986_p8 = por %p985_p11, %p984_p0 }
  0x80   : > { %p987_p3 = pnand %p986_p8, %p980_p9 }
  0x82   : > { %990 = shalt.err (!%p987_p3)
}
  0x83   : > { %s1152_s26 = smov 192   ;;  %p1678_p10 = scmp.ne.s32.totalorder %s1675_s18, 0 }
  0x84   : > { %766 = dma.hbm_to_vmem [thread:$0]  (!%p1677_p4), %s1420_s0, 256, %s1446_s27, %s1335_s3, %s1152_s26, %s1149_s7, %s1150_s4  }
  0x85   : > { %312 = sbr.rel (%p1678_p10) target bundleno = 808 (0x328), region = 48  ;;  %s314_s29 = sand.u32 (!%p1678_p10), 1, %s1364_s6  }
  0x86   : > { %s316_s9 = sand.u32 (!%p1678_p10), 1, %s1121_s8   ;;  %s315_s23 = scalar_lea.sflag (!%p1678_p10), [#allocation4], %s314_s29 }
  0x87   : > { %s1480_s12 = sshll.u32 (!%p1678_p10), %s316_s9, 2  ;;  %p1679_p12 = scmp.ne.s32.totalorder (!%p1678_p10), %s1670_s16, 0 }
  0x88   : > { %s318_s20 = scalar_lea.vmem (!%p1678_p10), [#allocation3], %s1480_s12 }
  0x8c   : > { %1076 = dma.done.wait (%p1679_p12), %s315_s23, 64  }
  0x8d   : > { %1078 = vsyncadd (%p1679_p12), %s315_s23, 4294967232  ;;  %p1680_p4 = scmp.eq.s32.totalorder %s1364_s6, 0 }
  0x8f   : > { %1080 = dma.done.wait (%p1680_p4), [#allocation7], 256   ;;  %p1681_p2 = pmov %p1680_p4 }
  0x90   : > { %s329_s0 = sand.u32 1, %s1109_s28   ;;  %p1682_p13 = scmp.ne.s32.totalorder %s1672_s10, 0 }
  0x91   : > { %1082 = vsyncadd (%p1681_p2), [#allocation7], 4294967040  ;;  %s1492_s2 = sshll.u32 %s329_s0, 4 }
  0x92   : > { %s331_s3 = scalar_lea.vmem [#allocation8], %s1492_s2 }
  0x93   : > { %1084 = dma.done.wait (%p1682_p13), %s315_s23, 256  }
  0x94   : > { %1086 = vsyncadd (%p1682_p13), %s315_s23, 4294967040  ;;  %s1683_s16 = sld [smem:[#allocation17_spill]]  ;;  %s367_s18 = sand.u32 1, %s1097_s25  }
  0x95   : > { %s1503_s6 = sshll.u32 %s367_s18, 3  ;;  %s1684_s17 = sld [smem:[#allocation30_spill]] }
  0x96   : > { %s369_s21 = scalar_lea.vmem [#allocation9], %s1503_s6 }
  0x9a   : > { %p370_p1 = scmp.lt.s32.totalorder %s1683_s16, 2  ;;  %p708_p5 = scmp.ne.s32.totalorder %s1683_s16, 0 }
  0x9b   : > { %v895_v0 = vld [vmem:[#allocation6] sm:$0xff] (!%p708_p5)   ;;  %v1153_v1 = vmov (!%p708_p5), 0.0   ;;  %v896_v2 = vld [vmem:[#allocation6 + $0x8] sm:$0xff] (!%p708_p5)   ;;  %vm1154_vm0 = vmmov (!%p708_p5), 0   ;;  %v378_v3 = vld [vmem:[%s318_s20] sm:$0xf] (!%p708_p5) }
  0x9c   : > { %s1506_s27 = scalar_select %p370_p1, %s1683_s16, 2 }
  0x9d   : > { %377 = sbr.rel (%p708_p5) target bundleno = 571 (0x23b), region = 64  ;;  %729 = vmatprep.subr.bf16.mxu0 (!%p708_p5), %v1153_v1  ;;  %733 = vmatprep.mubr.msk.bf16.mxu0 (!%p708_p5), %vm1154_vm0, %v1153_v1  ;;  %vm402_vm1 = vcmask (!%p708_p5), 261120   ;;  %s1685_s22 = sld [smem:[#allocation27_spill]] (!%p708_p5)  ;;  %vm485_vm2 = vcmask (!%p708_p5), 257024  }
  0x9e   : > { %s372_s15 = scalar_lea.vmem %s1684_s17, %s1506_s27  ;;  %730 = vmatpush3.bf16.msra.mxu0 (!%p708_p5), %v895_v0  ;;  %s1686_s29 = sld [smem:[#allocation28_spill]] (!%p708_p5) }
  0x9f   : > { %731 = vmatprep.subr.bf16.mxu0 (!%p708_p5), %v1153_v1  ;;  %s1687_s23 = sld [smem:[#allocation29_spill]] (!%p708_p5) }
  0xa2   : > { %732 = vmatpush3.bf16.msra.mxu0 (!%p708_p5), %v896_v2 }
  0xa3   : > { %v709_v4 = vld [vmem:[%s1685_s22] ss:$0 sm:$0xff] (!%p708_p5) }
  0xa4   : > { %v713_v28 = vld [vmem:[%s1686_s29] ss:$0 sm:$0xff] }
  0xa5   : > { %734 = vmatmul.mubr.msk.bf16.vlgmr.msra.gmra.mrb[0].mxu0 %vm402_vm1, %v378_v3  ;;  %v714_v30 = vld [vmem:[%s1687_s23] ss:$0 sm:$0xff] }
 0x178   : > { %v440_v5 = vpop.f32.mrb[0].mxu0 }
 0x179   : > { %v441_v6 = vadd.f32 %v709_v4, %v440_v5  ;;  %v735_v7 = vpop.f32.mrb[1].mxu0 }
 0x17a   : > { %v443_v8 = vpop.f32.mrb[2].mxu0 }
 0x17b   : > { %v447_v9 = vmul.f32 0.70710677, %v441_v6  ;;  %v736_v10 = vpop.f32.mrb[3].mxu0  ;;  %v446_v12 = vmul.f32 0.5, %v441_v6 }
 0x17d   : > { %897 = verf.f32 %v447_v9 }
 0x187   : > { %v898_v11 = vpop.eup %897 }
 0x188   : > { %v449_v13 = vadd.f32 1.0, %v898_v11 }
 0x18a   : > { %v450_v14 = vmul.f32 %v449_v13, %v446_v12 }
 0x18c   : > { %v451_v15 = vsel %vm402_vm1, %v450_v14, 0.0  ;;  %v456_v16 = vmul.f32 %v450_v14, %v450_v14 }
 0x18d   : > { %452 = vadd.xlane.f32.xlu0 %v451_v15 }
 0x18e   : > { %v457_v17 = vsel %vm402_vm1, %v456_v16, 0.0 }
 0x191   : > { %458 = vadd.xlane.f32.xlu0 %v457_v17 }
 0x21a   : > { %v453_v18 = vpop.xlane.xlu0 %452 }
 0x21b   : > { %v455_v19 = vmul.f32 0.03125, %v453_v18 }
 0x21d   : > { %v461_v21 = vmul.f32 %v455_v19, %v455_v19  ;;  %v464_v26 = vsub.f32 %v450_v14, %v455_v19 }
 0x21e   : > { %v459_v20 = vpop.xlane.xlu0 %458 }
 0x21f   : > { %v460_v22 = vmul.f32 0.03125, %v459_v20 }
 0x221   : > { %v462_v23 = vsub.f32 %v460_v22, %v461_v21 }
 0x223   : > { %v463_v24 = vmax.f32 %v462_v23, 0.0 }
 0x225   : > { %v465_v25 = vadd.f32 1e-12, %v463_v24 }
 0x227   : > { %899 = vrsqrt.f32 %v465_v25 }
 0x231   : > { %v900_v27 = vpop.eup %899 }
 0x232   : > { %v467_v29 = vmul.f32 %v900_v27, %v464_v26 }
 0x234   : > { %v475_v31 = vmul.f32 %v713_v28, %v467_v29 }
 0x236   : > { %v483_v32 = vadd.f32 %v714_v30, %v475_v31 }
 0x238   : > { %v484_v33 = vpack.c.bf16 %v483_v32, %v483_v32 }
 0x23a   : > { %486 = vst.msk [vmem:[#allocation2] sm:$0xf] %vm485_vm2, %v484_v33 }
 0x23b PF: > { %s1688_s20 = sld [smem:[#allocation18_spill]]  ;;  %s1689_s0 = sld [smem:[#allocation17_spill]]  ;;  %v901_v34 = vld [vmem:[%s331_s3] sm:$0xff]   ;;  %v1155_v35 = vmov 0.0   ;;  %v902_v36 = vld [vmem:[%s331_s3 + $0x8] sm:$0xff]   ;;  %vm1156_vm3 = vmmov 0  }
 0x23c   : > { %737 = vmatprep.subr.bf16.mxu0 %v1155_v35  ;;  %741 = vmatprep.mubr.msk.bf16.mxu0 %vm1156_vm3, %v1155_v35  ;;  %vm511_vm4 = vcmask 261120   ;;  %v715_v38 = vld [vmem:[%s372_s15] ss:$0 sm:$0xff]  ;;  %s572_s2 = sshll.u32 %s369_s21, 4  ;;  %s1691_s13 = sld [smem:[#allocation31_spill]]  ;;  %s1544_s2 = int_to_ptr.vmem [resolvable:$true] %s572_s2 }
 0x23d   : > { %738 = vmatpush3.bf16.msra.mxu0 %v901_v34  ;;  %s557_s27 = scalar_lea.sflag [#allocation5], %s367_s18  ;;  %s991_s15 = scalar_lea.vmem %s1544_s2, 128 }
 0x23e   : > { %739 = vmatprep.subr.bf16.mxu0 %v1155_v35  ;;  %p992_p6 = scmp.ne.s32.totalorder %s1544_s2, %s991_s15  ;;  %p1693_p7 = scmp.ne.s32.totalorder %s1673_s19, 0 }
 0x23f   : > { %s1157_s29 = smov [#allocation9]  }
 0x240   : > { %p993_p9 = pnand %p992_p6, %p1693_p7  ;;  %s995_s9 = sshll.u32 %s1157_s29, 4  ;;  %s996_s9 = int_to_ptr.vmem [resolvable:$false] %s995_s9 }
 0x241   : > { %740 = vmatpush3.bf16.msra.mxu0 %v902_v36  ;;  %v487_v37 = vld [vmem:[#allocation2] sm:$0xf]  ;;  %s745_s16 = smul.u32 3, %s1688_s20  ;;  %s997_s12 = scalar_lea.vmem %s996_s9, 256 }
 0x242   : > { %s1692_s23 = smov %s1691_s13  ;;  %p994_p0 = pneg %p993_p9 }
 0x243   : > { %s568_s7 = sadd.s32 %s1689_s0, %s745_s16  ;;  %p998_p11 = scmp.lt.s32.totalorder %s1544_s2, %s996_s9 }
 0x244   : > { %742 = vmatmul.mubr.msk.bf16.vlgmr.msra.gmra.mrb[0].mxu0 %vm511_vm4, %v487_v37  ;;  %s720_s11 = sshll.u32 %s568_s7, 7  ;;  %p999_p8 = scmp.lt.s32.totalorder %s997_s12, %s991_s15 }
 0x245   : > { %s1542_s26 = scalar_lea.hbm %s1691_s13, %s720_s11 }
 0x246   : > { %p1000_p3 = por %p999_p8, %p998_p11 }
 0x248   : > { %p1001_p10 = pnand %p1000_p3, %p994_p0 }
 0x317   : > { %v549_v39 = vpop.f32.mrb[0].mxu0 }
 0x318   : > { %v550_v40 = vadd.f32 %v715_v38, %v549_v39  ;;  %v743_v41 = vpop.f32.mrb[1].mxu0 }
 0x319   : > { %v552_v42 = vpop.f32.mrb[2].mxu0 }
 0x31a   : > { %555 = vst [vmem:[%s369_s21] sm:$0xff] %v550_v40  ;;  %v744_v43 = vpop.f32.mrb[3].mxu0 }
 0x31b   : > { %1004 = shalt.err (!%p1001_p10)
}
 0x31c   : > { %s1005_s18 = scalar_lea.hbm %s1542_s26, 128  ;;  %s1009_s20 = scalar_lea.hbm %s1692_s23, 768 }
 0x31d   : > { %p1006_p12 = scmp.ne.s32.totalorder %s1542_s26, %s1005_s18  ;;  %p1010_p13 = scmp.lt.u32.totalorder %s1542_s26, %s1692_s23 }
 0x31e   : > { %p1011_p1 = scmp.lt.u32.totalorder %s1009_s20, %s1005_s18  ;;  %p1013_p6 = scmp.lt.u32.totalorder %s1005_s18, %s1542_s26 }
 0x31f   : > { %p1007_p4 = pnand %p1006_p12, %p1693_p7 }
 0x320   : > { %p1012_p5 = por %p1011_p1, %p1010_p13 }
 0x321   : > { %p1008_p2 = pneg %p1007_p4 }
 0x322   : > { %p1014_p9 = por %p1013_p6, %p1012_p5 }
 0x324   : > { %p1015_p0 = pnand %p1014_p9, %p1008_p2 }
 0x326   : > { %1018 = shalt.err (!%p1015_p0)
}
 0x327   : > { %754 = dma.vmem_to_hbm [thread:$0]  (%p1693_p7), %s1544_s2, 128, %s1542_s26, %s557_s27  }
 0x328 PF: > { %p774_p11 = scmp.ge.s32.totalorder %s1145_s14, 2  ;;  %s584_s7 = sand.u32 1, %s1093_s24  }
 0x329   : > { %p1694_p8 = scmp.ne.s32.totalorder %s1674_s30, 0  ;;  %s585_s4 = scalar_lea.sflag [#allocation5], %s584_s7 }
 0x32b   : > { %p768_p3 = pnand %p774_p11, %p1694_p8 }
 0x32d   : > { %1088 = dma.done.wait (!%p768_p3), %s585_s4, 128  }
 0x32e   : > { %1090 = vsyncadd (!%p768_p3), %s585_s4, 4294967168  ;;  %s24_s14 = sadd.s32 1, %s1145_s14   ;;  %s1696_s19 = sld [smem:[#allocation14_spill]] }
 0x32f   : > { %p1576_p10 = scmp.ge.s32.totalorder %s24_s14, 8   ;;  %s1697_s26 = sld [smem:[#allocation25_spill]] }
 0x330   : > { %s1698_s10 = sld [smem:[#allocation15_spill]]  ;;  %s1699_s29 = sld [smem:[#allocation23_spill]] }
 0x331   : > { %s1700_s11 = sld [smem:[#allocation16_spill]]  ;;  %s1701_s9 = sld [smem:[#allocation24_spill]] }
 0x332   : > { %s1702_s2 = sld [smem:[#allocation19_spill]]  ;;  %s1703_s3 = sld [smem:[#allocation20_spill]] }
 0x333   : > { %s1704_s12 = sld [smem:[#allocation21_spill]]  ;;  %s1705_s13 = sld [smem:[#allocation22_spill]] }
 0x334   : > { %s1706_s24 = smov %s1097_s25  ;;  %s1707_s25 = smov %s1696_s19 }
 0x335   : > { %s1708_s27 = smov %s1109_s28  ;;  %s1710_s30 = smov %s1121_s8 }
 0x336   : > { %s1709_s28 = smov %s1698_s10  ;;  %23 = sbr.rel (!%p1576_p10) target bundleno = 18 (0x12), region = 115 }
 0x337   : > { %s1711_s8 = smov %s1700_s11 }
 0x338   : > { %s1712_s10 = smov %s1702_s2  ;;  %s1713_s11 = smov %s1703_s3 }
 0x33d   :  { %590 = vsyncpa [#allocation4], 1 }
 0x33e   :  { %592 = vsyncpa [#allocation4 + $0x1], 1 }
 0x33f   :  { %593 = vsyncpa [#allocation7], 1 }
 0x340   :  { %594 = vsyncpa [#allocation5], 1 }
 0x341   :  { %596 = vsyncpa [#allocation5 + $0x1], 1 }

</bundles_post_ra>
